<compile_context>
chip_gen: v5e
topology: v5e:2x2
jax: 0.10.0
libtpu: 0.0.40
codegen_flags: <defaults>
</compile_context>

<pallas_src>
import math

import jax
import jax.numpy as jnp
from jax.experimental import pallas as pl

# ---- module hyper-parameters (SagittariusTransformerDecoder.__init__) ----
NUM_CLASSES = 2                        # C
CLASS_SIZES = [5, 3]
CAT_DIMS = [4, 4]
TEMPORAL_DIM = 8                       # V
LD = 32                                # output_latent_dim
VALUE_DIM = 32                         # input_latent_dim (must equal LD)
NUM_HEADS = 2                          # H
NUM_REF_POINTS = 8                     # S
MINT, MAXT = 0.0, 1.0
KQ_DIM = TEMPORAL_DIM + sum(CAT_DIMS)  # 16

N_BATCH = 2
T_SEQ = NUM_REF_POINTS                 # value length must equal S (broadcast)
T_QUERY = T_SEQ                        # query/time-point length
_SCALE = 1.0 / math.sqrt(KQ_DIM)

# ---- packed weight-slab layout (one VMEM operand -> one input DMA) ----
_SLAB_LANES = NUM_HEADS * KQ_DIM       # 32 (== LD)
assert _SLAB_LANES == LD
_WQ_R0 = 0                                           # (KQ_DIM, H*KQ_DIM)
_BQ_R0 = _WQ_R0 + KQ_DIM                             # (1, H*KQ_DIM)
_HK_R0 = ((_BQ_R0 + 1 + 7) // 8) * 8                 # (H*S, KQ_DIM), pre-scaled
_WO_R0 = _HK_R0 + NUM_HEADS * NUM_REF_POINTS         # (H*LD, LD)
_BO_R0 = _WO_R0 + NUM_HEADS * LD                     # (1, LD)
_SLAB_ROWS = ((_BO_R0 + 1 + 7) // 8) * 8             # 8-row aligned sections


# ------------------------- Pallas attention kernel -------------------------
def _mha_kernel(q_ref, v_ref, w_ref, o_ref):
    """Single-invocation multi-head attention, everything resident in VMEM.

    q_ref : (N, Tq, kq)   queries (class + time embeddings)
    v_ref : (N, S, ld)    values (emb_seq)
    w_ref : (_SLAB_ROWS, _SLAB_LANES)  packed batch-invariant parameters:
              rows [_WQ_R0 : +kq]     Wq   (kq, H*kq)
              row  [_BQ_R0]           bq   (1, H*kq)
              rows [_HK_R0 : +H*S]    keys (H*S, kq)   pre-projected * 1/sqrt(kq)
              rows [_WO_R0 : +H*ld]   Wo   (H*ld, ld)
              row  [_BO_R0]           bo   (1, ld)
    o_ref : (N, 1, Tq*ld) lane-dense output, viewed back to (N,Tq,ld) outside
    """
    N, Tq, kq = q_ref.shape
    _, S, ld = v_ref.shape
    H = NUM_HEADS
    M = N * Tq

    # (N, Tq, kq) -> (N*Tq, kq): free leading-dim merge (Tq == sublane tile).
    q2 = q_ref[...].reshape(M, kq)
    v = v_ref[...]

    # Query projection: one 2D MXU pass (M, kq) @ (kq, H*kq).
    wq = w_ref[_WQ_R0:_WQ_R0 + kq, :]
    bq = w_ref[_BQ_R0:_BQ_R0 + 1, :]
    hq = jnp.dot(q2, wq, preferred_element_type=jnp.float32) + bq      # (M, H*kq)

    # Per-head attention (H == 2, statically unrolled); keys come pre-scaled,
    # so there is no score-scaling multiply in the kernel.
    ctx_heads = []
    for h in range(H):
        hq_h = hq[:, h * kq:(h + 1) * kq]                               # (M, kq)
        hk_h = w_ref[_HK_R0 + h * S:_HK_R0 + (h + 1) * S, :kq]          # (S, kq)
        s = jnp.einsum("mk,sk->ms", hq_h, hk_h,
                       preferred_element_type=jnp.float32)              # (M, S)
        # softmax over the S reference points (== softmax over dim=-2 of the
        # repeat_interleave'd PyTorch scores); exact reciprocal.
        s = s - jnp.max(s, axis=-1, keepdims=True)
        e = jnp.exp(s)
        p = e / jnp.sum(e, axis=-1, keepdims=True)
        ctx = jnp.einsum("nts,nsd->ntd", p.reshape(N, Tq, S), v,
                         preferred_element_type=jnp.float32)            # (N,Tq,ld)
        ctx_heads.append(ctx.reshape(M, ld))

    # Output projection: concat(heads) @ Wo + bo contracts (head, ld) jointly
    # in one (M, H*ld) @ (H*ld, ld) MXU pass -- no separate head-sum.
    ctx_cat = jnp.concatenate(ctx_heads, axis=-1)                       # (M, H*ld)
    wo = w_ref[_WO_R0:_WO_R0 + H * ld, :]
    bo = w_ref[_BO_R0:_BO_R0 + 1, :]
    out = jnp.dot(ctx_cat, wo, preferred_element_type=jnp.float32) + bo  # (M, ld)

    # Lane-dense store: fold (Tq, ld) into the lane axis -> (N, 1, Tq*ld),
    # built from sublane slices + minor-dim concat (always-supported ops).
    out3 = out.reshape(N, Tq, ld)
    flat = jnp.concatenate([out3[:, t:t + 1, :] for t in range(Tq)], axis=-1)
    o_ref[...] = flat


def mha_pallas(query, value, w_slab):
    """query: (N,Tq,kq); value: (N,S,ld); w_slab: packed weights -> (N,Tq,ld)."""
    N, Tq, kq = query.shape
    _, S, ld = value.shape
    assert value.shape[0] == N and Tq == S == NUM_REF_POINTS
    assert kq == KQ_DIM and ld == LD == VALUE_DIM
    assert w_slab.shape == (_SLAB_ROWS, _SLAB_LANES)
    M, H = N * Tq, NUM_HEADS

    flops = 2 * M * (kq * H * kq + H * kq * S + H * S * ld + H * ld * ld)
    bytes_accessed = 4 * (query.size + value.size + w_slab.size + M * ld)
    cost = pl.CostEstimate(flops=int(flops), transcendentals=int(H * M * S),
                           bytes_accessed=int(bytes_accessed))

    # No grid: single invocation, every operand held whole in VMEM.
    out_flat = pl.pallas_call(
        _mha_kernel,
        out_shape=jax.ShapeDtypeStruct((N, 1, Tq * ld), jnp.float32),
        cost_estimate=cost,
    )(query, value, w_slab)
    return out_flat.reshape(N, Tq, ld)


# ------------------------------ JAX glue ------------------------------
def time_embedding(ts, temp_dim):
    """Sinusoidal embedding, mirrors SagittariusLayers.get_time_embeddings:
    pos = 48*t, div = exp(arange(0,V,2) * -(ln 10 / V)), even idx sin, odd cos."""
    pos = 48.0 * ts[..., None]
    div = jnp.exp(jnp.arange(0, temp_dim, 2, dtype=jnp.float32)
                  * (-math.log(10.0) / temp_dim))
    s = jnp.sin(pos * div)
    c = jnp.cos(pos * div)
    return jnp.stack([s, c], axis=-1).reshape(ts.shape + (temp_dim,))


def class_embedding(ys, tables):
    """ys[k]: int indices (...,) -> (..., sum(CAT_DIMS))."""
    return jnp.concatenate(
        [jnp.take(tables[k], ys[k], axis=0) for k in range(len(tables))], axis=-1)


def init_params(rng):
    ks = jax.random.split(rng, 2 + 6)
    tables = [0.1 * jax.random.normal(ks[k], (CLASS_SIZES[k] + 1, CAT_DIMS[k]),
                                      jnp.float32) for k in range(NUM_CLASSES)]
    hkq = NUM_HEADS * KQ_DIM
    Wq = 0.1 * jax.random.normal(ks[2], (KQ_DIM, hkq), jnp.float32)
    bq = 0.1 * jax.random.normal(ks[3], (1, hkq), jnp.float32)
    Wk = 0.1 * jax.random.normal(ks[4], (KQ_DIM, hkq), jnp.float32)
    bk = 0.1 * jax.random.normal(ks[5], (1, hkq), jnp.float32)
    Wo = 0.1 * jax.random.normal(ks[6], (NUM_HEADS * LD, LD), jnp.float32)
    bo = 0.1 * jax.random.normal(ks[7], (1, LD), jnp.float32)
    return dict(emb_tables=tables, Wq=Wq, bq=bq, Wk=Wk, bk=bk, Wo=Wo, bo=bo)


def _pack_weight_slab(Wq, bq, hk_heads_scaled, Wo, bo):
    """Pack all batch-invariant parameters into one lane-aligned f32 slab."""
    slab = jnp.zeros((_SLAB_ROWS, _SLAB_LANES), jnp.float32)
    slab = slab.at[_WQ_R0:_WQ_R0 + KQ_DIM, :NUM_HEADS * KQ_DIM].set(Wq)
    slab = slab.at[_BQ_R0, :NUM_HEADS * KQ_DIM].set(bq.reshape(-1))
    slab = slab.at[_HK_R0:_HK_R0 + NUM_HEADS * NUM_REF_POINTS,
                   :KQ_DIM].set(hk_heads_scaled)
    slab = slab.at[_WO_R0:_WO_R0 + NUM_HEADS * LD, :LD].set(Wo)
    slab = slab.at[_BO_R0, :LD].set(bo.reshape(-1))
    return slab


def sagittarius_transformer_decoder(emb_seq, ys, ts, params):
    """Mirrors SagittariusTransformerDecoder.forward (num_cont=None, mask=None)."""
    N, T, d = emb_seq.shape
    assert d == LD and LD == VALUE_DIM
    assert T == NUM_REF_POINTS  # required by the PyTorch value broadcast

    # queries: class embeddings + time embeddings of measured time points
    z_ys = class_embedding(ys, params["emb_tables"])           # (N, Tq, sum cat)
    z_ts = time_embedding(ts, TEMPORAL_DIM)                    # (N, Tq, temporal)
    query = jnp.concatenate([z_ys, z_ts], axis=-1)             # (N, Tq, kq)

    # keys: "unknown" class embedding + embedded reference time points
    unk_ids = [jnp.full((NUM_REF_POINTS,), CLASS_SIZES[k], jnp.int32)
               for k in range(NUM_CLASSES)]
    z_unk = class_embedding(unk_ids, params["emb_tables"])     # (S, sum cat)
    ref_ts = jnp.linspace(MINT, MAXT, NUM_REF_POINTS, dtype=jnp.float32)
    z_reft = time_embedding(ref_ts[None, :], TEMPORAL_DIM)[0]  # (S, temporal)
    key = jnp.concatenate([z_unk, z_reft], axis=-1)            # (S, kq)

    # Hoisted batch-invariant key projection, with 1/sqrt(kq) folded in.
    hk = jnp.dot(key, params["Wk"], precision="highest") + params["bk"]  # (S, H*kq)
    hk_heads = (_SCALE * hk).reshape(NUM_REF_POINTS, NUM_HEADS, KQ_DIM)
    hk_heads = hk_heads.transpose(1, 0, 2).reshape(
        NUM_HEADS * NUM_REF_POINTS, KQ_DIM)                    # (H*S, kq)

    w_slab = _pack_weight_slab(params["Wq"], params["bq"], hk_heads,
                               params["Wo"], params["bo"])
    return mha_pallas(query, emb_seq, w_slab)


# ------------------------ pure-JAX reference (check) ------------------------
def _reference_attention(query, key, value, Wq, bq, Wk, bk, Wo, bo):
    N, Tq, kq = query.shape
    S = key.shape[0]
    hq = (query.reshape(-1, kq) @ Wq + bq).reshape(N, Tq, NUM_HEADS, kq)
    hq = hq.transpose(0, 2, 1, 3)                                       # (N, H, Tq, kq)
    hk = (key @ Wk + bk).reshape(S, NUM_HEADS, kq).transpose(1, 0, 2)   # (H, S, kq)
    scores = jnp.einsum("nhtk,hsk->nhts", hq, hk) / math.sqrt(kq)
    p = jax.nn.softmax(scores, axis=-1)
    out = jnp.einsum("nhts,nsd->nhtd", p, value)
    out = out.transpose(0, 2, 1, 3).reshape(N, Tq, NUM_HEADS * LD)
    return out @ Wo + bo


if __name__ == "__main__":
    root = jax.random.PRNGKey(0)
    k_param, k_seq, k_ts, k_y0, k_y1 = jax.random.split(root, 5)

    params = init_params(k_param)

    emb_seq = jax.random.normal(k_seq, (N_BATCH, T_SEQ, LD), jnp.float32)
    ts = jax.random.uniform(k_ts, (N_BATCH, T_QUERY), jnp.float32,
                            minval=MINT, maxval=MAXT)
    ys = [jax.random.randint(k_y0, (N_BATCH, T_QUERY), 0, CLASS_SIZES[0]),
          jax.random.randint(k_y1, (N_BATCH, T_QUERY), 0, CLASS_SIZES[1])]

    out = sagittarius_transformer_decoder(emb_seq, ys, ts, params)
    out = jax.block_until_ready(out)

    # sanity check against a pure-JAX reference of the same math.
    # NOTE: the time/class embedding helpers are shared between the kernel path
    # and the reference, so this check validates the attention math (not the
    # embedding constants themselves, which mirror the PyTorch formulas above).
    z_ys = class_embedding(ys, params["emb_tables"])
    z_ts = time_embedding(ts, TEMPORAL_DIM)
    query = jnp.concatenate([z_ys, z_ts], axis=-1)
    unk_ids = [jnp.full((NUM_REF_POINTS,), CLASS_SIZES[k], jnp.int32)
               for k in range(NUM_CLASSES)]
    z_unk = class_embedding(unk_ids, params["emb_tables"])
    ref_ts = jnp.linspace(MINT, MAXT, NUM_REF_POINTS, dtype=jnp.float32)
    z_reft = time_embedding(ref_ts[None, :], TEMPORAL_DIM)[0]
    key = jnp.concatenate([z_unk, z_reft], axis=-1)
    with jax.default_matmul_precision("highest"):
        ref = _reference_attention(query, key, emb_seq,
                                   params["Wq"], params["bq"][0],
                                   params["Wk"], params["bk"][0],
                                   params["Wo"], params["bo"][0])
    ref = jax.block_until_ready(ref)

    assert out.shape == (N_BATCH, T_QUERY, LD)
    # exact softmax reciprocal + f32 matmuls -> f32-level tolerance
    # (was 1e-2 with the approximate EUP reciprocal).
    assert jnp.allclose(out, ref, atol=1e-4, rtol=1e-4)
    print("KERNEL_OK")
</pallas_src>

<mosaic_0001>
module attributes {stable_mosaic.version = 11 : i64} {
  func.func @_mha_kernel(%arg0: memref<2x8x16xf32, #tpu.memory_space<vmem>>, %arg1: memref<2x8x32xf32, #tpu.memory_space<vmem>>, %arg2: memref<112x32xf32, #tpu.memory_space<vmem>>, %arg3: memref<2x1x256xf32, #tpu.memory_space<vmem>>) attributes {dimension_semantics = [], scalar_prefetch = 0 : i64, scratch_operands = 0 : i64, tpu.core_type = #tpu.core_type<tc>} {
    %c0 = arith.constant 0 : index
    %c0_0 = arith.constant 0 : index
    %c0_1 = arith.constant 0 : index
    %0 = vector.load %arg0[%c0, %c0_0, %c0_1] : memref<2x8x16xf32, #tpu.memory_space<vmem>>, vector<2x8x16xf32>
    %1 = vector.shape_cast %0 : vector<2x8x16xf32> to vector<16x16xf32>
    %c0_2 = arith.constant 0 : index
    %c0_3 = arith.constant 0 : index
    %c0_4 = arith.constant 0 : index
    %2 = vector.load %arg1[%c0_2, %c0_3, %c0_4] : memref<2x8x32xf32, #tpu.memory_space<vmem>>, vector<2x8x32xf32>
    %c0_5 = arith.constant 0 : index
    %c0_6 = arith.constant 0 : index
    %3 = vector.load %arg2[%c0_5, %c0_6] : memref<112x32xf32, #tpu.memory_space<vmem>>, vector<16x32xf32>
    %c16 = arith.constant 16 : index
    %c0_7 = arith.constant 0 : index
    %4 = vector.load %arg2[%c16, %c0_7] : memref<112x32xf32, #tpu.memory_space<vmem>>, vector<1x32xf32>
    %cst = arith.constant dense<0.000000e+00> : vector<16x32xf32>
    %5 = tpu.matmul %1, %3, %cst {dimension_numbers = #tpu.dot_dimension_numbers<[1], [0], [0], [1], [0, 0, 1, 1], [], []>} : vector<16x16xf32>, vector<16x32xf32>, vector<16x32xf32> -> vector<16x32xf32>
    %6 = vector.broadcast %4 : vector<1x32xf32> to vector<16x32xf32>
    %7 = arith.addf %5, %6 : vector<16x32xf32>
    %8 = vector.extract_strided_slice %7 {offsets = [0, 0], sizes = [16, 16], strides = [1, 1]} : vector<16x32xf32> to vector<16x16xf32>
    %c24 = arith.constant 24 : index
    %c0_8 = arith.constant 0 : index
    %9 = vector.load %arg2[%c24, %c0_8] : memref<112x32xf32, #tpu.memory_space<vmem>>, vector<8x16xf32>
    "tpu.trace_start"() <{level = 10 : i32, message = "mk,sk->ms"}> : () -> ()
    %cst_9 = arith.constant dense<0.000000e+00> : vector<16x8xf32>
    %10 = tpu.matmul %8, %9, %cst_9 {dimension_numbers = #tpu.dot_dimension_numbers<[1], [1], [0], [0], [0, 0, 1, 0], [], []>} : vector<16x16xf32>, vector<8x16xf32>, vector<16x8xf32> -> vector<16x8xf32>
    "tpu.trace_stop"() : () -> ()
    %cst_10 = arith.constant dense<0xFF800000> : vector<16xf32>
    %11 = vector.multi_reduction <maximumf>, %10, %cst_10 [1] : vector<16x8xf32> to vector<16xf32>
    %12 = vector.shape_cast %11 : vector<16xf32> to vector<16x1xf32>
    %13 = vector.broadcast %12 : vector<16x1xf32> to vector<16x8xf32>
    %14 = arith.subf %10, %13 : vector<16x8xf32>
    %15 = math.exp %14 : vector<16x8xf32>
    %cst_11 = arith.constant dense<0.000000e+00> : vector<16xf32>
    %16 = vector.multi_reduction <add>, %15, %cst_11 [1] : vector<16x8xf32> to vector<16xf32>
    %17 = vector.shape_cast %16 : vector<16xf32> to vector<16x1xf32>
    %18 = vector.broadcast %17 : vector<16x1xf32> to vector<16x8xf32>
    %19 = arith.divf %15, %18 : vector<16x8xf32>
    %20 = vector.shape_cast %19 : vector<16x8xf32> to vector<2x8x8xf32>
    "tpu.trace_start"() <{level = 10 : i32, message = "nts,nsd->ntd"}> : () -> ()
    %cst_12 = arith.constant dense<0.000000e+00> : vector<2x8x32xf32>
    %21 = tpu.matmul %20, %2, %cst_12 {dimension_numbers = #tpu.dot_dimension_numbers<[2], [1], [1], [2], [0, 0, 0, 1, 1, 2], [0], [0]>} : vector<2x8x8xf32>, vector<2x8x32xf32>, vector<2x8x32xf32> -> vector<2x8x32xf32>
    "tpu.trace_stop"() : () -> ()
    %22 = vector.shape_cast %21 : vector<2x8x32xf32> to vector<16x32xf32>
    %23 = vector.extract_strided_slice %7 {offsets = [0, 16], sizes = [16, 16], strides = [1, 1]} : vector<16x32xf32> to vector<16x16xf32>
    %c32 = arith.constant 32 : index
    %c0_13 = arith.constant 0 : index
    %24 = vector.load %arg2[%c32, %c0_13] : memref<112x32xf32, #tpu.memory_space<vmem>>, vector<8x16xf32>
    "tpu.trace_start"() <{level = 10 : i32, message = "mk,sk->ms"}> : () -> ()
    %cst_14 = arith.constant dense<0.000000e+00> : vector<16x8xf32>
    %25 = tpu.matmul %23, %24, %cst_14 {dimension_numbers = #tpu.dot_dimension_numbers<[1], [1], [0], [0], [0, 0, 1, 0], [], []>} : vector<16x16xf32>, vector<8x16xf32>, vector<16x8xf32> -> vector<16x8xf32>
    "tpu.trace_stop"() : () -> ()
    %cst_15 = arith.constant dense<0xFF800000> : vector<16xf32>
    %26 = vector.multi_reduction <maximumf>, %25, %cst_15 [1] : vector<16x8xf32> to vector<16xf32>
    %27 = vector.shape_cast %26 : vector<16xf32> to vector<16x1xf32>
    %28 = vector.broadcast %27 : vector<16x1xf32> to vector<16x8xf32>
    %29 = arith.subf %25, %28 : vector<16x8xf32>
    %30 = math.exp %29 : vector<16x8xf32>
    %cst_16 = arith.constant dense<0.000000e+00> : vector<16xf32>
    %31 = vector.multi_reduction <add>, %30, %cst_16 [1] : vector<16x8xf32> to vector<16xf32>
    %32 = vector.shape_cast %31 : vector<16xf32> to vector<16x1xf32>
    %33 = vector.broadcast %32 : vector<16x1xf32> to vector<16x8xf32>
    %34 = arith.divf %30, %33 : vector<16x8xf32>
    %35 = vector.shape_cast %34 : vector<16x8xf32> to vector<2x8x8xf32>
    "tpu.trace_start"() <{level = 10 : i32, message = "nts,nsd->ntd"}> : () -> ()
    %cst_17 = arith.constant dense<0.000000e+00> : vector<2x8x32xf32>
    %36 = tpu.matmul %35, %2, %cst_17 {dimension_numbers = #tpu.dot_dimension_numbers<[2], [1], [1], [2], [0, 0, 0, 1, 1, 2], [0], [0]>} : vector<2x8x8xf32>, vector<2x8x32xf32>, vector<2x8x32xf32> -> vector<2x8x32xf32>
    "tpu.trace_stop"() : () -> ()
    %37 = vector.shape_cast %36 : vector<2x8x32xf32> to vector<16x32xf32>
    %38 = tpu.concatenate %22, %37 in 1 : vector<16x32xf32>, vector<16x32xf32> -> vector<16x64xf32>
    %c40 = arith.constant 40 : index
    %c0_18 = arith.constant 0 : index
    %39 = vector.load %arg2[%c40, %c0_18] : memref<112x32xf32, #tpu.memory_space<vmem>>, vector<64x32xf32>
    %c104 = arith.constant 104 : index
    %c0_19 = arith.constant 0 : index
    %40 = vector.load %arg2[%c104, %c0_19] : memref<112x32xf32, #tpu.memory_space<vmem>>, vector<1x32xf32>
    %cst_20 = arith.constant dense<0.000000e+00> : vector<16x32xf32>
    %41 = tpu.matmul %38, %39, %cst_20 {dimension_numbers = #tpu.dot_dimension_numbers<[1], [0], [0], [1], [0, 0, 1, 1], [], []>} : vector<16x64xf32>, vector<64x32xf32>, vector<16x32xf32> -> vector<16x32xf32>
    %42 = vector.broadcast %40 : vector<1x32xf32> to vector<16x32xf32>
    %43 = arith.addf %41, %42 : vector<16x32xf32>
    %44 = vector.shape_cast %43 : vector<16x32xf32> to vector<2x8x32xf32>
    %45 = vector.extract_strided_slice %44 {offsets = [0, 0, 0], sizes = [2, 1, 32], strides = [1, 1, 1]} : vector<2x8x32xf32> to vector<2x1x32xf32>
    %46 = vector.extract_strided_slice %44 {offsets = [0, 1, 0], sizes = [2, 1, 32], strides = [1, 1, 1]} : vector<2x8x32xf32> to vector<2x1x32xf32>
    %47 = vector.extract_strided_slice %44 {offsets = [0, 2, 0], sizes = [2, 1, 32], strides = [1, 1, 1]} : vector<2x8x32xf32> to vector<2x1x32xf32>
    %48 = vector.extract_strided_slice %44 {offsets = [0, 3, 0], sizes = [2, 1, 32], strides = [1, 1, 1]} : vector<2x8x32xf32> to vector<2x1x32xf32>
    %49 = vector.extract_strided_slice %44 {offsets = [0, 4, 0], sizes = [2, 1, 32], strides = [1, 1, 1]} : vector<2x8x32xf32> to vector<2x1x32xf32>
    %50 = vector.extract_strided_slice %44 {offsets = [0, 5, 0], sizes = [2, 1, 32], strides = [1, 1, 1]} : vector<2x8x32xf32> to vector<2x1x32xf32>
    %51 = vector.extract_strided_slice %44 {offsets = [0, 6, 0], sizes = [2, 1, 32], strides = [1, 1, 1]} : vector<2x8x32xf32> to vector<2x1x32xf32>
    %52 = vector.extract_strided_slice %44 {offsets = [0, 7, 0], sizes = [2, 1, 32], strides = [1, 1, 1]} : vector<2x8x32xf32> to vector<2x1x32xf32>
    %53 = tpu.concatenate %45, %46, %47, %48, %49, %50, %51, %52 in 2 : vector<2x1x32xf32>, vector<2x1x32xf32>, vector<2x1x32xf32>, vector<2x1x32xf32>, vector<2x1x32xf32>, vector<2x1x32xf32>, vector<2x1x32xf32>, vector<2x1x32xf32> -> vector<2x1x256xf32>
    %c0_21 = arith.constant 0 : index
    %c0_22 = arith.constant 0 : index
    %c0_23 = arith.constant 0 : index
    %54 = vector.load %arg3[%c0_21, %c0_22, %c0_23] : memref<2x1x256xf32, #tpu.memory_space<vmem>>, vector<2x1x256xf32>
    tpu.vector_store %arg3[%c0_21, %c0_22, %c0_23], %53 {strides = array<i32>} : memref<2x1x256xf32, #tpu.memory_space<vmem>>, vector<2x1x256xf32>,
    return
  }
}

</mosaic_0001>

<bundles_post_ra>
// kernel: tpu_custom_call.1
= control target key start
LH: loop header
LB: loop body
LE: loop exit
PB: predicated region body
PF: predicated region fallthrough
CT: control target
= control target key end

     0   :  { %vm23_vm0 = vcmask 130048   ;;  %s665_s0 = inlined_call_operand.vmem [shape: f32[2,8,16], index: 0, kind: input, shape index: {}]   ;;  %s666_s1 = inlined_call_operand.vmem [shape: f32[2,8,32], index: 1, kind: input, shape index: {}]   ;;  %s667_s2 = inlined_call_operand.vmem [shape: f32[112,32], index: 2, kind: input, shape index: {}]   ;;  %s668_s3 = inlined_call_operand.hbm [shape: f32[2,1,256], index: 3, kind: output, shape index: {}]  }
   0x1   :  { %v20_v0 = vld [vmem:[%s667_s2 + $0x8] sm:$0xff]  ;;  %v19_v1 = vld [vmem:[%s667_s2] sm:$0xff] }
   0x2   :  { %44 = vmatpush.msra.mxu0 %v20_v0  ;;  %v15_v2 = vld [vmem:[%s665_s0] sm:$0xff] }
   0x3   :  { %8 = vsyncpa [#allocation3], 0  ;;  %v16_v3 = vld [vmem:[%s665_s0 + $0x8] sm:$0xff]  ;;  %v53_v4 = vld [vmem:[%s667_s2 + $0x18] sm:$0xff]  ;;  %s535_s24 = smov 112   ;;  %vm86_vm1 = vcmask 64512  }
   0x4   :  { %45 = vmatpush.msra.mxu0 %v19_v1  ;;  %465 = vmatpush.xpose.msk.msra.mxu1 %vm23_vm0, %v53_v4  ;;  %v491_v5 = vld [vmem:[%s667_s2 + $0x10] ss:$0 sm:$0xff]  ;;  %v17_v24 = vld [vmem:[%s666_s1] sm:$0xff]  ;;  %v18_v29 = vld [vmem:[%s666_s1 + $0x8] sm:$0xff]  ;;  %s536_s16 = smov 32   ;;  %s537_s21 = smov 64  }
   0x5   :  { %463 = vmatmul.msk.f32.vlgmr.msra.gmra.mxu0 %vm23_vm0, %v15_v2  ;;  %153 = vmatpush.msra.mxu2 %v17_v24  ;;  %v181_v25 = vld [vmem:[%s667_s2 + $0x20] sm:$0xff]  ;;  %s538_s22 = smov 96   ;;  %s451_s25 = sshll.u32 %s668_s3, 4  ;;  %s452_s25 = int_to_ptr.hbm [resolvable:$true] %s451_s25 }
   0x6   :  { %176 = vmatpush.msra.mxu3 %v18_v29  ;;  %s540_s26 = smov 2  }
   0x7   :  { %470 = vmatpush.xpose.msk.msrb.mxu2 %vm23_vm0, %v181_v25 }
   0x8   :  { %282 = vmatpush.msrb.mxu3 %v17_v24 }
   0xd   :  { %464 = vmatmul.msk.f32.gmra.mxu0 %vm23_vm0, %v16_v3 }
  0x82   :  { %v47_v6 = vpop.f32.mrf.mxu0 }
  0x83   :  { %v48_v7 = vadd.f32 %v491_v5, %v47_v6 }
  0x85   :  { %182 = vrot.lane.b32.xlu1 %v48_v7, %s535_s24  ;;  %466 = vmatmul.msk.f32.vlgmr.msra.gmra.mxu1 %vm23_vm0, %v48_v7 }
  0x8a   :  { %v50_v8 = vpop.f32.mrf.mxu0 }
  0x8b   :  { %v51_v9 = vadd.f32 %v491_v5, %v50_v8 }
  0x8d   :  { %467 = vmatmul.msk.f32.gmra.mxu1 %vm23_vm0, %v51_v9  ;;  %184 = vrot.lane.b32.xlu1 %v51_v9, %s535_s24 }
  0xf7   :  { %v183_v26 = vpop.permute.xlu1 %182 }
  0xff   :  { %v185_v27 = vpop.permute.xlu1 %184 }
 0x102   :  { %v80_v10 = vpop.f32.mrf.mxu1 }
 0x103   :  { %v87_v11 = vsel %vm86_vm1, %v80_v10, -inf }
 0x104   :  { %88 = vmax.xlane.f32.xlu0 %v87_v11 }
 0x10a   :  { %v83_v12 = vpop.f32.mrf.mxu1 }
 0x10b   :  { %v90_v13 = vsel %vm86_vm1, %v83_v12, -inf }
 0x10c   :  { %91 = vmax.xlane.f32.xlu2 %v90_v13 }
 0x177   :  { %v89_v14 = vpop.xlane.xlu0 %88 }
 0x178   :  { %v93_v15 = vsub.f32 %v80_v10, %v89_v14 }
 0x17a   :  { %v95_v16 = vmul.f32 1.442695, %v93_v15 }
 0x17c   :  { %493 = vpow2.f32 %v95_v16 }
 0x17f   :  { %v92_v17 = vpop.xlane.xlu2 %91 }
 0x180   :  { %v94_v18 = vsub.f32 %v83_v12, %v92_v17 }
 0x182   :  { %v494_v19 = vpop.eup %493  ;;  %v97_v20 = vmul.f32 1.442695, %v94_v18 }
 0x183   :  { %v99_v21 = vsel %vm86_vm1, %v494_v19, 0.0 }
 0x184   :  { %100 = vadd.xlane.f32.xlu0 %v99_v21  ;;  %495 = vpow2.f32 %v97_v20 }
 0x18a   :  { %v496_v22 = vpop.eup %495 }
 0x18b   :  { %v102_v23 = vsel %vm86_vm1, %v496_v22, 0.0 }
 0x18c   :  { %103 = vadd.xlane.f32.xlu1 %v102_v23 }
 0x1f7   :  { %v101_v28 = vpop.xlane.xlu0 %100 }
 0x1f8   :  { %497 = vrcp.f32 %v101_v28  ;;  %v116_v34 = vand.u32 2147483648, %v101_v28  ;;  %v114_v36 = vand.u32 2147483647, %v101_v28  ;;  %vm110_vm3 = vweird.f32 %v101_v28 }
 0x1fa   :  { %v117_v39 = vor.u32 1.1754944e-38, %v116_v34  ;;  %vm115_vm5 = vcmp.eq.f32.partialorder %v114_v36, 8.507059e+37  ;;  %v322_v34 = vld [vmem:[%s667_s2 + $0x30] sm:$0xff] }
 0x1fe   :  { %v498_v30 = vpop.eup %497 }
 0x1ff   :  { %v106_v31 = vmul.f32 %v498_v30, %v101_v28  ;;  %v104_v32 = vpop.xlane.xlu1 %103  ;;  %vm111_vm2 = vweird.f32 %v498_v30  ;;  %v328_v28 = vld [vmem:[%s667_s2 + $0x60] sm:$0xff] }
 0x200   :  { %499 = vrcp.f32 %v104_v32  ;;  %vm112_vm4 = vmor %vm110_vm3, %vm111_vm2  ;;  %vm125_vm6 = vweird.f32 %v104_v32  ;;  %v131_v43 = vand.u32 2147483648, %v104_v32  ;;  %v129_v46 = vand.u32 2147483647, %v104_v32  ;;  %346 = vmatpush.msrb.mxu0 %v328_v28  ;;  %477 = vmatpush.msrb.mxu1 %v328_v28 }
 0x201   :  { %v107_v33 = vsub.f32 1.0, %v106_v31  ;;  %v325_v31 = vld [vmem:[%s667_s2 + $0x48] sm:$0xff]  ;;  %vm331_vm3 = vcmask 523264  }
 0x202   :  { %v132_v48 = vor.u32 1.1754944e-38, %v131_v43  ;;  %vm130_vm9 = vcmp.eq.f32.partialorder %v129_v46, 8.507059e+37  ;;  %v492_v43 = vld [vmem:[%s667_s2 + $0x68] ss:$0 sm:$0xff] }
 0x203   :  { %v108_v35 = vmul.f32 %v498_v30, %v107_v33  ;;  %v323_v33 = vld [vmem:[%s667_s2 + $0x38] sm:$0xff] }
 0x205   :  { %v109_v37 = vadd.f32 %v498_v30, %v108_v35 }
 0x206   :  { %v500_v38 = vpop.eup %499 }
 0x207   :  { %v113_v40 = vsel %vm112_vm4, %v498_v30, %v109_v37  ;;  %v121_v41 = vmul.f32 %v500_v38, %v104_v32  ;;  %vm126_vm7 = vweird.f32 %v500_v38  ;;  %v326_v30 = vld [vmem:[%s667_s2 + $0x50] sm:$0xff]  ;;  %v324_v32 = vld [vmem:[%s667_s2 + $0x40] sm:$0xff]  ;;  %vm419_vm4 = vcmask 785408  }
 0x208   :  { %v118_v42 = vsel %vm115_vm5, %v117_v39, %v113_v40  ;;  %vm127_vm8 = vmor %vm125_vm6, %vm126_vm7  ;;  %vm434_vm5 = vcmask 1040384  }
 0x209   :  { %v119_v44 = vmul.f32 %v494_v19, %v118_v42  ;;  %v122_v45 = vsub.f32 1.0, %v121_v41 }
 0x20b   :  { %468 = vmatmul.msk.f32.vlgmr.msra.gmra.mxu2 %vm86_vm1, %v119_v44  ;;  %v123_v47 = vmul.f32 %v500_v38, %v122_v45 }
 0x20d   :  { %v124_v49 = vadd.f32 %v500_v38, %v123_v47 }
 0x20f   :  { %v128_v50 = vsel %vm127_vm8, %v500_v38, %v124_v49  ;;  %v321_v38 = vld [vmem:[%s667_s2 + $0x28] sm:$0xff] }
 0x210   :  { %v133_v51 = vsel %vm130_vm9, %v132_v48, %v128_v50 }
 0x211   :  { %v134_v52 = vmul.f32 %v496_v22, %v133_v51 }
 0x213   :  { %471 = vmatmul.msk.f32.vlgmr.msrb.gmra.mxu2 %vm23_vm0, %v183_v26  ;;  %469 = vmatmul.msk.f32.vlgmr.msra.gmra.mxu3 %vm86_vm1, %v134_v52 }
 0x214   :  { %305 = vmatpush.msra.mxu3 %v18_v29  ;;  %v327_v29 = vld [vmem:[%s667_s2 + $0x58] sm:$0xff]  ;;  %s539_s2 = smov [#allocation2]  }
 0x215   :  { %347 = vmatpush.msrb.mxu0 %v327_v29  ;;  %478 = vmatpush.msrb.mxu1 %v327_v29  ;;  %s449_s23 = sshll.u32 %s539_s2, 4  ;;  %s450_s23 = int_to_ptr.vmem [resolvable:$true] %s449_s23 }
 0x217   :  { %348 = vmatpush.msrb.mxu0 %v326_v30  ;;  %479 = vmatpush.msrb.mxu1 %v326_v30 }
 0x219   :  { %349 = vmatpush.msrb.mxu0 %v325_v31  ;;  %480 = vmatpush.msrb.mxu1 %v325_v31 }
 0x21b   :  { %472 = vmatmul.msk.f32.gmra.mxu2 %vm23_vm0, %v185_v27  ;;  %350 = vmatpush.msrb.mxu0 %v324_v32 }
 0x21c   :  { %481 = vmatpush.msrb.mxu1 %v324_v32 }
 0x21d   :  { %351 = vmatpush.msrb.mxu0 %v323_v33 }
 0x21e   :  { %482 = vmatpush.msrb.mxu1 %v323_v33 }
 0x21f   :  { %352 = vmatpush.msrb.mxu0 %v322_v34 }
 0x220   :  { %483 = vmatpush.msrb.mxu1 %v322_v34 }
 0x221   :  { %353 = vmatpush.msrb.mxu0 %v321_v38 }
 0x222   :  { %484 = vmatpush.msrb.mxu1 %v321_v38 }
 0x28e   :  { %v602_v53 = vpop.f32.mrf.mxu2 }
 0x296   :  { %v210_v54 = vpop.f32.mrf.mxu2  ;;  %v178_v35 = vpop.f32.mrf.mxu3 }
 0x297   :  { %v216_v55 = vsel %vm86_vm1, %v210_v54, -inf }
 0x298   :  { %217 = vmax.xlane.f32.xlu2 %v216_v55 }
 0x29e   :  { %v213_v56 = vpop.f32.mrf.mxu2 }
 0x29f   :  { %v219_v57 = vsel %vm86_vm1, %v213_v56, -inf }
 0x2a0   :  { %220 = vmax.xlane.f32.xlu0 %v219_v57 }
 0x30b   :  { %v218_v58 = vpop.xlane.xlu2 %217 }
 0x30c   :  { %v222_v59 = vsub.f32 %v210_v54, %v218_v58 }
 0x30e   :  { %v224_v60 = vmul.f32 1.442695, %v222_v59 }
 0x310   :  { %501 = vpow2.f32 %v224_v60 }
 0x313   :  { %v221_v61 = vpop.xlane.xlu0 %220 }
 0x314   :  { %v223_v62 = vsub.f32 %v213_v56, %v221_v61 }
 0x316   :  { %v502_v63 = vpop.eup %501  ;;  %v226_v0 = vmul.f32 1.442695, %v223_v62 }
 0x317   :  { %v228_v1 = vsel %vm86_vm1, %v502_v63, 0.0 }
 0x318   :  { %503 = vpow2.f32 %v226_v0  ;;  %229 = vadd.xlane.f32.xlu2 %v228_v1 }
 0x31e   :  { %v504_v2 = vpop.eup %503 }
 0x31f   :  { %v231_v3 = vsel %vm86_vm1, %v504_v2, 0.0 }
 0x320   :  { %232 = vadd.xlane.f32.xlu0 %v231_v3 }
 0x38b   :  { %v230_v4 = vpop.xlane.xlu2 %229 }
 0x38c   :  { %505 = vrcp.f32 %v230_v4  ;;  %v245_v9 = vand.u32 2147483648, %v230_v4  ;;  %v243_v11 = vand.u32 2147483647, %v230_v4  ;;  %vm239_vm11 = vweird.f32 %v230_v4 }
 0x38e   :  { %v246_v14 = vor.u32 1.1754944e-38, %v245_v9  ;;  %vm244_vm13 = vcmp.eq.f32.partialorder %v243_v11, 8.507059e+37 }
 0x392   :  { %v506_v5 = vpop.eup %505 }
 0x393   :  { %v235_v6 = vmul.f32 %v506_v5, %v230_v4  ;;  %v233_v7 = vpop.xlane.xlu0 %232  ;;  %vm240_vm10 = vweird.f32 %v506_v5 }
 0x394   :  { %507 = vrcp.f32 %v233_v7  ;;  %vm241_vm12 = vmor %vm239_vm11, %vm240_vm10  ;;  %v260_v20 = vand.u32 2147483648, %v233_v7  ;;  %v258_v22 = vand.u32 2147483647, %v233_v7  ;;  %vm254_vm15 = vweird.f32 %v233_v7 }
 0x395   :  { %v236_v8 = vsub.f32 1.0, %v235_v6 }
 0x396   :  { %v261_v24 = vor.u32 1.1754944e-38, %v260_v20  ;;  %vm259_vm2 = vcmp.eq.f32.partialorder %v258_v22, 8.507059e+37 }
 0x397   :  { %v237_v10 = vmul.f32 %v506_v5, %v236_v8 }
 0x399   :  { %v238_v12 = vadd.f32 %v506_v5, %v237_v10  ;;  %v439_v10 = vlaneseq }
 0x39a   :  { %v508_v13 = vpop.eup %507 }
 0x39b   :  { %v250_v15 = vmul.f32 %v508_v13, %v233_v7  ;;  %v242_v16 = vsel %vm241_vm12, %v506_v5, %v238_v12  ;;  %vm255_vm14 = vweird.f32 %v508_v13  ;;  %vm441_vm6 = vcmp.lt.s32.totalorder %v439_v10, 256 }
 0x39c   :  { %v247_v17 = vsel %vm244_vm13, %v246_v14, %v242_v16  ;;  %vm256_vm0 = vmor %vm254_vm15, %vm255_vm14 }
 0x39d   :  { %v251_v18 = vsub.f32 1.0, %v250_v15  ;;  %v248_v19 = vmul.f32 %v502_v63, %v247_v17 }
 0x39f   :  { %v252_v21 = vmul.f32 %v508_v13, %v251_v18  ;;  %473 = vmatmul.msk.f32.vlgmr.msrb.gmra.mxu3 %vm86_vm1, %v248_v19 }
 0x3a1   :  { %v253_v23 = vadd.f32 %v508_v13, %v252_v21 }
 0x3a3   :  { %v257_v25 = vsel %vm256_vm0, %v508_v13, %v253_v23 }
 0x3a4   :  { %v262_v26 = vsel %vm259_vm2, %v261_v24, %v257_v25 }
 0x3a5   :  { %v263_v27 = vmul.f32 %v504_v2, %v262_v26 }
 0x3a7   :  { %474 = vmatmul.msk.f32.vlgmr.msra.gmra.mxu3 %vm86_vm1, %v263_v27  ;;  %vm318_vm1 = vcmask 261120  }
 0x422   :  { %v284_v36 = vpop.f32.mrf.mxu3 }
 0x423   :  { %312 = vrot.lane.b32.xlu2 %v284_v36, %s536_s16 }
 0x42a   :  { %v307_v37 = vpop.f32.mrf.mxu3 }
 0x42b   :  { %314 = vrot.lane.b32.xlu0 %v307_v37, %s536_s16 }
 0x47d   :  { %v313_v39 = vpop.permute.xlu2 %312 }
 0x47e   :  { %v319_v40 = vsel %vm318_vm1, %v602_v53, %v313_v39 }
 0x47f   :  { %475 = vmatmul.msk.f32.vlgmr.msrb.gmra.mxu0 %vm331_vm3, %v319_v40 }
 0x49d   :  { %v315_v41 = vpop.permute.xlu0 %314 }
 0x49e   :  { %v320_v42 = vsel %vm318_vm1, %v178_v35, %v315_v41 }
 0x49f   :  { %476 = vmatmul.msk.f32.vlgmr.msrb.gmra.mxu1 %vm331_vm3, %v320_v42 }
 0x4fc   :  { %v355_v44 = vpop.f32.mrf.mxu0 }
 0x4fd   :  { %v356_v45 = vadd.f32 %v492_v43, %v355_v44 }
 0x4ff   :  { %v391_v46 = vrot.slane %v356_v45, 5  ;;  %v363_v47 = vrot.slane %v356_v45, 1  ;;  %v399_v48 = vrot.slane %v356_v45, 6  ;;  %v407_v49 = vrot.slane %v356_v45, 7 }
 0x500   :  { %v371_v50 = vrot.slane %v356_v45, 2  ;;  %v379_v56 = vrot.slane %v356_v45, 3  ;;  %v387_v6 = vrot.slane %v356_v45, 4 }
 0x501   :  { %393 = vrot.lane.b32.xlu2 %v391_v46, %s536_s16  ;;  %365 = vrot.lane.b32.xlu0 %v363_v47, %s536_s16 }
 0x509   :  { %401 = vrot.lane.b32.xlu2 %v399_v48, %s537_s21  ;;  %409 = vrot.lane.b32.xlu0 %v407_v49, %s538_s22 }
 0x511   :  { %373 = vrot.lane.b32.xlu0 %v371_v50, %s537_s21 }
 0x51c   :  { %v358_v51 = vpop.f32.mrf.mxu1 }
 0x51d   :  { %v359_v52 = vadd.f32 %v492_v43, %v358_v51 }
 0x51f   :  { %v400_v53 = vrot.slane %v359_v52, 6  ;;  %v392_v54 = vrot.slane %v359_v52, 5  ;;  %v364_v55 = vrot.slane %v359_v52, 1  ;;  %v380_v57 = vrot.slane %v359_v52, 3 }
 0x520   :  { %v408_v58 = vrot.slane %v359_v52, 7  ;;  %v372_v59 = vrot.slane %v359_v52, 2  ;;  %v388_v3 = vrot.slane %v359_v52, 4 }
 0x521   :  { %403 = vrot.lane.b32.xlu1 %v400_v53, %s537_s21  ;;  %395 = vrot.lane.b32.xlu0 %v392_v54, %s536_s16 }
 0x522   :  { %367 = vrot.lane.b32.xlu2 %v364_v55, %s536_s16 }
 0x529   :  { %381 = vrot.lane.b32.xlu1 %v379_v56, %s538_s22  ;;  %383 = vrot.lane.b32.xlu0 %v380_v57, %s538_s22 }
 0x52a   :  { %411 = vrot.lane.b32.xlu2 %v408_v58, %s538_s22 }
 0x532   :  { %375 = vrot.lane.b32.xlu2 %v372_v59, %s537_s21 }
 0x55b   :  { %v394_v60 = vpop.permute.xlu2 %393 }
 0x55c   :  { %v422_v9 = vsel %vm318_vm1, %v387_v6, %v394_v60 }
 0x563   :  { %v402_v62 = vpop.permute.xlu2 %401 }
 0x564   :  { %v424_v11 = vsel %vm331_vm3, %v422_v9, %v402_v62 }
 0x573   :  { %v366_v61 = vpop.permute.xlu0 %365 }
 0x574   :  { %v415_v15 = vsel %vm318_vm1, %v356_v45, %v366_v61 }
 0x57b   :  { %v410_v63 = vpop.permute.xlu0 %409 }
 0x57c   :  { %v368_v0 = vpop.permute.xlu2 %367  ;;  %v426_v12 = vsel %vm419_vm4, %v424_v11, %v410_v63 }
 0x57d   :  { %v416_v16 = vsel %vm318_vm1, %v359_v52, %v368_v0  ;;  %v432_v17 = vrot.slane %v426_v12, 7 }
 0x583   :  { %v374_v1 = vpop.permute.xlu0 %373 }
 0x584   :  { %v412_v2 = vpop.permute.xlu2 %411  ;;  %v417_v18 = vsel %vm331_vm3, %v415_v15, %v374_v1 }
 0x58c   :  { %v376_v13 = vpop.permute.xlu2 %375 }
 0x58d   :  { %v418_v19 = vsel %vm331_vm3, %v416_v16, %v376_v13 }
 0x593   :  { %v404_v4 = vpop.permute.xlu1 %403  ;;  %v396_v5 = vpop.permute.xlu0 %395 }
 0x594   :  { %v423_v7 = vsel %vm318_vm1, %v388_v3, %v396_v5 }
 0x595   :  { %v425_v8 = vsel %vm331_vm3, %v423_v7, %v404_v4 }
 0x596   :  { %v427_v14 = vsel %vm419_vm4, %v425_v8, %v412_v2 }
 0x597   :  { %v433_v20 = vrot.slane %v427_v14, 7 }
 0x59b   :  { %v382_v21 = vpop.permute.xlu1 %381  ;;  %v384_v22 = vpop.permute.xlu0 %383 }
 0x59c   :  { %v420_v23 = vsel %vm419_vm4, %v417_v18, %v382_v21  ;;  %v421_v24 = vsel %vm419_vm4, %v418_v19, %v384_v22 }
 0x59d   :  { %v435_v25 = vsel %vm434_vm5, %v420_v23, %v432_v17  ;;  %v436_v26 = vsel %vm434_vm5, %v421_v24, %v433_v20 }
 0x59e   :  { %443 = vst.msk [vmem:[#allocation2] sm:$0x3] %vm441_vm6, %v435_v25 }
 0x59f   :  { %444 = vst.msk [vmem:[#allocation2 + $0x2] sm:$0x3] %vm441_vm6, %v436_v26 }
 0x5a0   :  { %457 = dma.vmem_to_hbm [thread:$0]  %s450_s23, 64, %s452_s25, [#allocation3], %s536_s16, %s536_s16, %s540_s26  }
 0x5a1   :  { %533 = dma.done.wait [#allocation3], 64  }
 0x5a2   :  { %534 = vsyncadd [#allocation3], 4294967232 }
 0x5a3   :  { %462 = vsyncpa [#allocation3], 1 }

</bundles_post_ra>
